<compile_context>
chip_gen: v7x
topology: tpu7x:2x2x1
jax: 0.10.0
libtpu: 0.0.40
codegen_flags: <defaults>
</compile_context>

<pallas_src>
from functools import partial

import jax
import jax.numpy as jnp
from jax.experimental import pallas as pl
from jax.experimental.pallas import tpu as pltpu

LANE = 128     # f32 lane width
SUBLANE = 8    # f32 sublane width


def _round_up(n, m):
    return ((n + m - 1) // m) * m


def mlp_kernel(x_ref, w1_ref, b1_ref, w2_ref, b2_ref, o_ref, *, f_in, hidden):
    """x_ref: (TB, 128) padded inputs (real features in lanes [:f_in]).
    w1_ref: (8, 128)   rows [:f_in]  valid, cols [:hidden] valid, rest zero.
    w2_ref: (8, 128)   rows [:hidden] valid, cols [:f_out] valid, rest zero.
    b*_ref: (1, 128)   zero-padded biases.
    o_ref : (TB, 128)  lane-dense output slab (real output in lanes [:f_out])."""
    x = x_ref[...]
    w1 = w1_ref[...]
    w2 = w2_ref[...]

    # Layer 1: h = relu(x @ W1 + b1) as unrolled VPU broadcast-FMAs (f_in terms).
    h = jnp.broadcast_to(b1_ref[...], x.shape)
    for k in range(f_in):
        h = h + x[:, k:k + 1] * w1[k:k + 1, :]
    h = jnp.maximum(h, 0.0)          # padded lanes stay exactly 0

    # Layer 2: o = h @ W2 + b2 as unrolled VPU broadcast-FMAs (hidden terms).
    o = jnp.broadcast_to(b2_ref[...], x.shape)
    for k in range(hidden):
        o = o + h[:, k:k + 1] * w2[k:k + 1, :]

    o_ref[...] = o.astype(o_ref.dtype)


def make_params(sizes=(3, 6, 3), seed=0):
    """Deterministic init mirroring nn.Linear (weight stored transposed as (in, out))."""
    key = jax.random.PRNGKey(seed)
    params = []
    for i in range(len(sizes) - 1):
        fan_in, fan_out = sizes[i], sizes[i + 1]
        key, kw, kb = jax.random.split(key, 3)
        bound = 1.0 / (fan_in ** 0.5)
        w = jax.random.uniform(kw, (fan_in, fan_out), jnp.float32, -bound, bound)
        b = jax.random.uniform(kb, (1, fan_out), jnp.float32, -bound, bound)
        params.append((w, b))
    return params


def pad_params(params):
    """One-time padding of weights/biases to (8k, 128)-aligned, zero-filled slabs."""
    padded = []
    for w, b in params:
        fin, fout = w.shape
        wp = jnp.zeros((_round_up(fin, SUBLANE), _round_up(fout, LANE)), w.dtype)
        wp = wp.at[:fin, :fout].set(w)
        bp = jnp.zeros((1, _round_up(fout, LANE)), b.dtype)
        bp = bp.at[:, :fout].set(b.reshape(1, -1))
        padded.append((wp, bp))
    return padded


def linear_model_forward(x, padded_params, sizes, *, batch_tile=512):
    """Forward pass equivalent to LinearModel((3,6,3)) on x of shape (B, 3)."""
    (w1p, b1p), (w2p, b2p) = padded_params
    f_in, hidden, f_out = sizes
    B = x.shape[0]
    kern = partial(mlp_kernel, f_in=f_in, hidden=hidden)

    if B <= batch_tile:
        # --- small batch: single whole-array VMEM blocks, no grid / pipeline ---
        Bp = _round_up(max(B, SUBLANE), SUBLANE)
        x_pad = jnp.zeros((Bp, LANE), x.dtype).at[:B, :f_in].set(x)
        out_pad = pl.pallas_call(
            kern,
            out_shape=jax.ShapeDtypeStruct((Bp, LANE), x.dtype),
            in_specs=[pl.BlockSpec(memory_space=pltpu.MemorySpace.VMEM)] * 5,
            out_specs=pl.BlockSpec(memory_space=pltpu.MemorySpace.VMEM),
        )(x_pad, w1p, b1p, w2p, b2p)
    else:
        # --- large batch: tile over B, auto-pipelined, "parallel" for megacore ---
        Bp = _round_up(B, batch_tile)
        x_pad = jnp.zeros((Bp, LANE), x.dtype).at[:B, :f_in].set(x)
        out_pad = pl.pallas_call(
            kern,
            out_shape=jax.ShapeDtypeStruct((Bp, LANE), x.dtype),
            grid=(Bp // batch_tile,),
            in_specs=[
                pl.BlockSpec((batch_tile, LANE), lambda i: (i, 0)),
                pl.BlockSpec(w1p.shape, lambda i: (0, 0)),
                pl.BlockSpec(b1p.shape, lambda i: (0, 0)),
                pl.BlockSpec(w2p.shape, lambda i: (0, 0)),
                pl.BlockSpec(b2p.shape, lambda i: (0, 0)),
            ],
            out_specs=pl.BlockSpec((batch_tile, LANE), lambda i: (i, 0)),
            compiler_params=pltpu.CompilerParams(
                dimension_semantics=("parallel",)),
        )(x_pad, w1p, b1p, w2p, b2p)

    return out_pad[:B, :f_out]


def _reference(x, params):
    (w1, b1), (w2, b2) = params
    return jnp.maximum(x @ w1 + b1, 0.0) @ w2 + b2


if __name__ == "__main__":
    sizes = (3, 6, 3)
    params = make_params(sizes, seed=0)
    padded = pad_params(params)

    # Small-batch path (grid-less).
    batch = 2
    x = jax.random.normal(jax.random.PRNGKey(0), (batch, sizes[0]), jnp.float32)
    out = jax.block_until_ready(linear_model_forward(x, padded, sizes))
    ref = _reference(x, params)
    assert out.shape == (batch, sizes[-1])
    assert jnp.allclose(out, ref, atol=1e-5, rtol=1e-5)

    # Batch-tiled path (grid over B, "parallel").
    big_batch = 1024
    xb = jax.random.normal(jax.random.PRNGKey(1), (big_batch, sizes[0]), jnp.float32)
    out_b = jax.block_until_ready(linear_model_forward(xb, padded, sizes))
    ref_b = _reference(xb, params)
    assert out_b.shape == (big_batch, sizes[-1])
    assert jnp.allclose(out_b, ref_b, atol=1e-5, rtol=1e-5)

    print("KERNEL_OK")
</pallas_src>

<mosaic_0001>
module attributes {stable_mosaic.version = 11 : i64} {
  func.func @mlp_kernel(%arg0: memref<8x128xf32, #tpu.memory_space<vmem>>, %arg1: memref<8x128xf32, #tpu.memory_space<vmem>>, %arg2: memref<1x128xf32, #tpu.memory_space<vmem>>, %arg3: memref<8x128xf32, #tpu.memory_space<vmem>>, %arg4: memref<1x128xf32, #tpu.memory_space<vmem>>, %arg5: memref<8x128xf32, #tpu.memory_space<vmem>>) attributes {dimension_semantics = [], scalar_prefetch = 0 : i64, scratch_operands = 0 : i64, tpu.core_type = #tpu.core_type<tc>} {
    %c0 = arith.constant 0 : index
    %c0_0 = arith.constant 0 : index
    %0 = vector.load %arg0[%c0, %c0_0] : memref<8x128xf32, #tpu.memory_space<vmem>>, vector<8x128xf32>
    %c0_1 = arith.constant 0 : index
    %c0_2 = arith.constant 0 : index
    %1 = vector.load %arg1[%c0_1, %c0_2] : memref<8x128xf32, #tpu.memory_space<vmem>>, vector<8x128xf32>
    %c0_3 = arith.constant 0 : index
    %c0_4 = arith.constant 0 : index
    %2 = vector.load %arg3[%c0_3, %c0_4] : memref<8x128xf32, #tpu.memory_space<vmem>>, vector<8x128xf32>
    %c0_5 = arith.constant 0 : index
    %c0_6 = arith.constant 0 : index
    %3 = vector.load %arg2[%c0_5, %c0_6] : memref<1x128xf32, #tpu.memory_space<vmem>>, vector<1x128xf32>
    %4 = vector.shape_cast %3 : vector<1x128xf32> to vector<1x128xf32>
    %5 = vector.broadcast %4 : vector<1x128xf32> to vector<8x128xf32>
    %6 = vector.extract_strided_slice %0 {offsets = [0, 0], sizes = [8, 1], strides = [1, 1]} : vector<8x128xf32> to vector<8x1xf32>
    %7 = vector.extract_strided_slice %1 {offsets = [0, 0], sizes = [1, 128], strides = [1, 1]} : vector<8x128xf32> to vector<1x128xf32>
    %8 = vector.broadcast %6 : vector<8x1xf32> to vector<8x128xf32>
    %9 = vector.broadcast %7 : vector<1x128xf32> to vector<8x128xf32>
    %10 = arith.mulf %8, %9 : vector<8x128xf32>
    %11 = arith.addf %5, %10 : vector<8x128xf32>
    %12 = vector.extract_strided_slice %0 {offsets = [0, 1], sizes = [8, 1], strides = [1, 1]} : vector<8x128xf32> to vector<8x1xf32>
    %13 = vector.extract_strided_slice %1 {offsets = [1, 0], sizes = [1, 128], strides = [1, 1]} : vector<8x128xf32> to vector<1x128xf32>
    %14 = vector.broadcast %12 : vector<8x1xf32> to vector<8x128xf32>
    %15 = vector.broadcast %13 : vector<1x128xf32> to vector<8x128xf32>
    %16 = arith.mulf %14, %15 : vector<8x128xf32>
    %17 = arith.addf %11, %16 : vector<8x128xf32>
    %18 = vector.extract_strided_slice %0 {offsets = [0, 2], sizes = [8, 1], strides = [1, 1]} : vector<8x128xf32> to vector<8x1xf32>
    %19 = vector.extract_strided_slice %1 {offsets = [2, 0], sizes = [1, 128], strides = [1, 1]} : vector<8x128xf32> to vector<1x128xf32>
    %20 = vector.broadcast %18 : vector<8x1xf32> to vector<8x128xf32>
    %21 = vector.broadcast %19 : vector<1x128xf32> to vector<8x128xf32>
    %22 = arith.mulf %20, %21 : vector<8x128xf32>
    %23 = arith.addf %17, %22 : vector<8x128xf32>
    %cst = arith.constant 0.000000e+00 : f32
    %24 = vector.broadcast %cst : f32 to vector<8x128xf32>
    %25 = arith.maximumf %23, %24 : vector<8x128xf32>
    %c0_7 = arith.constant 0 : index
    %c0_8 = arith.constant 0 : index
    %26 = vector.load %arg4[%c0_7, %c0_8] : memref<1x128xf32, #tpu.memory_space<vmem>>, vector<1x128xf32>
    %27 = vector.shape_cast %26 : vector<1x128xf32> to vector<1x128xf32>
    %28 = vector.broadcast %27 : vector<1x128xf32> to vector<8x128xf32>
    %29 = vector.extract_strided_slice %25 {offsets = [0, 0], sizes = [8, 1], strides = [1, 1]} : vector<8x128xf32> to vector<8x1xf32>
    %30 = vector.extract_strided_slice %2 {offsets = [0, 0], sizes = [1, 128], strides = [1, 1]} : vector<8x128xf32> to vector<1x128xf32>
    %31 = vector.broadcast %29 : vector<8x1xf32> to vector<8x128xf32>
    %32 = vector.broadcast %30 : vector<1x128xf32> to vector<8x128xf32>
    %33 = arith.mulf %31, %32 : vector<8x128xf32>
    %34 = arith.addf %28, %33 : vector<8x128xf32>
    %35 = vector.extract_strided_slice %25 {offsets = [0, 1], sizes = [8, 1], strides = [1, 1]} : vector<8x128xf32> to vector<8x1xf32>
    %36 = vector.extract_strided_slice %2 {offsets = [1, 0], sizes = [1, 128], strides = [1, 1]} : vector<8x128xf32> to vector<1x128xf32>
    %37 = vector.broadcast %35 : vector<8x1xf32> to vector<8x128xf32>
    %38 = vector.broadcast %36 : vector<1x128xf32> to vector<8x128xf32>
    %39 = arith.mulf %37, %38 : vector<8x128xf32>
    %40 = arith.addf %34, %39 : vector<8x128xf32>
    %41 = vector.extract_strided_slice %25 {offsets = [0, 2], sizes = [8, 1], strides = [1, 1]} : vector<8x128xf32> to vector<8x1xf32>
    %42 = vector.extract_strided_slice %2 {offsets = [2, 0], sizes = [1, 128], strides = [1, 1]} : vector<8x128xf32> to vector<1x128xf32>
    %43 = vector.broadcast %41 : vector<8x1xf32> to vector<8x128xf32>
    %44 = vector.broadcast %42 : vector<1x128xf32> to vector<8x128xf32>
    %45 = arith.mulf %43, %44 : vector<8x128xf32>
    %46 = arith.addf %40, %45 : vector<8x128xf32>
    %47 = vector.extract_strided_slice %25 {offsets = [0, 3], sizes = [8, 1], strides = [1, 1]} : vector<8x128xf32> to vector<8x1xf32>
    %48 = vector.extract_strided_slice %2 {offsets = [3, 0], sizes = [1, 128], strides = [1, 1]} : vector<8x128xf32> to vector<1x128xf32>
    %49 = vector.broadcast %47 : vector<8x1xf32> to vector<8x128xf32>
    %50 = vector.broadcast %48 : vector<1x128xf32> to vector<8x128xf32>
    %51 = arith.mulf %49, %50 : vector<8x128xf32>
    %52 = arith.addf %46, %51 : vector<8x128xf32>
    %53 = vector.extract_strided_slice %25 {offsets = [0, 4], sizes = [8, 1], strides = [1, 1]} : vector<8x128xf32> to vector<8x1xf32>
    %54 = vector.extract_strided_slice %2 {offsets = [4, 0], sizes = [1, 128], strides = [1, 1]} : vector<8x128xf32> to vector<1x128xf32>
    %55 = vector.broadcast %53 : vector<8x1xf32> to vector<8x128xf32>
    %56 = vector.broadcast %54 : vector<1x128xf32> to vector<8x128xf32>
    %57 = arith.mulf %55, %56 : vector<8x128xf32>
    %58 = arith.addf %52, %57 : vector<8x128xf32>
    %59 = vector.extract_strided_slice %25 {offsets = [0, 5], sizes = [8, 1], strides = [1, 1]} : vector<8x128xf32> to vector<8x1xf32>
    %60 = vector.extract_strided_slice %2 {offsets = [5, 0], sizes = [1, 128], strides = [1, 1]} : vector<8x128xf32> to vector<1x128xf32>
    %61 = vector.broadcast %59 : vector<8x1xf32> to vector<8x128xf32>
    %62 = vector.broadcast %60 : vector<1x128xf32> to vector<8x128xf32>
    %63 = arith.mulf %61, %62 : vector<8x128xf32>
    %64 = arith.addf %58, %63 : vector<8x128xf32>
    %c0_9 = arith.constant 0 : index
    %c0_10 = arith.constant 0 : index
    %65 = vector.load %arg5[%c0_9, %c0_10] : memref<8x128xf32, #tpu.memory_space<vmem>>, vector<8x128xf32>
    tpu.vector_store %arg5[%c0_9, %c0_10], %64 {strides = array<i32>} : memref<8x128xf32, #tpu.memory_space<vmem>>, vector<8x128xf32>,
    return
  }
}

</mosaic_0001>

<bundles_post_ra>
// kernel: tpu_custom_call.1
= control target key start
LH: loop header
LB: loop body
LE: loop exit
PB: predicated region body
PF: predicated region fallthrough
CT: control target
= control target key end

     0   :  { %10 = vsyncpa [#allocation3], 0  ;;  %s348_s0 = inlined_call_operand.hbm [shape: f32[8,128], index: 0, kind: input, shape index: {}]   ;;  %s349_s1 = inlined_call_operand.hbm [shape: f32[8,128], index: 1, kind: input, shape index: {}]   ;;  %s350_s2 = inlined_call_operand.vmem [shape: f32[1,128], index: 2, kind: input, shape index: {}]   ;;  %s351_s3 = inlined_call_operand.vmem [shape: f32[8,128], index: 3, kind: input, shape index: {}]   ;;  %s352_s4 = inlined_call_operand.vmem [shape: f32[1,128], index: 4, kind: input, shape index: {}]   ;;  %s353_s5 = inlined_call_operand.hbm [shape: f32[8,128], index: 5, kind: output, shape index: {}]  }
   0x1   :  { %11 = vsyncpa [#allocation6], 0 }
   0x2   :  { %12 = vsyncpa [#allocation4], 0  ;;  %s264_s18 = smov [#allocation2]   ;;  %s265_s20 = smov [#allocation5]  }
   0x3   :  { %s19_s19 = sshll.u32 %s264_s18, 4  ;;  %s29_s21 = sshll.u32 %s265_s20, 4  ;;  %s20_s19 = int_to_ptr.vmem [resolvable:$true] %s19_s19  ;;  %s30_s21 = int_to_ptr.vmem [resolvable:$true] %s29_s21 }
   0x4   :  { %s192_s24 = scalar_lea.hbm %s348_s0, 128 }
   0x5   :  { %p193_p0 = scmp.ne.s32.totalorder %s348_s0, %s192_s24  ;;  %p196_p1 = scmp.lt.u32.totalorder %s192_s24, %s348_s0 }
   0x7   :  { %p198_p2 = pnand %p196_p1, %p193_p0 }
   0x9   :  { %201 = shalt.err (!%p198_p2)
}
   0xa   :  { %s202_s29 = scalar_lea.vmem %s20_s19, 128  ;;  %p207_p4 = scmp.lt.s32.totalorder %s20_s19, %s20_s19 }
   0xb   :  { %p203_p3 = scmp.ne.s32.totalorder %s20_s19, %s202_s29  ;;  %p208_p5 = scmp.lt.s32.totalorder %s202_s29, %s202_s29 }
   0xd   :  { %p209_p6 = por %p208_p5, %p207_p4 }
   0xf   :  { %p210_p7 = pnand %p209_p6, %p203_p3 }
  0x11   :  { %213 = shalt.err (!%p210_p7)
}
  0x12   :  { %22 = dma.hbm_to_vmem [thread:$0]  %s348_s0, 128, %s20_s19, [#allocation3]  }
  0x13   :  { %s214_s9 = scalar_lea.hbm %s349_s1, 128 }
  0x14   :  { %p215_p8 = scmp.ne.s32.totalorder %s349_s1, %s214_s9  ;;  %p218_p9 = scmp.lt.u32.totalorder %s214_s9, %s349_s1 }
  0x16   :  { %p220_p10 = pnand %p218_p9, %p215_p8 }
  0x18   :  { %223 = shalt.err (!%p220_p10)
}
  0x19   :  { %s224_s14 = scalar_lea.vmem %s30_s21, 128  ;;  %p229_p12 = scmp.lt.s32.totalorder %s30_s21, %s30_s21 }
  0x1a   :  { %p225_p11 = scmp.ne.s32.totalorder %s30_s21, %s224_s14  ;;  %p230_p13 = scmp.lt.s32.totalorder %s224_s14, %s224_s14 }
  0x1c   :  { %p231_p0 = por %p230_p13, %p229_p12 }
  0x1e   :  { %p232_p1 = pnand %p231_p0, %p225_p11 }
  0x20   :  { %235 = shalt.err (!%p232_p1)
}
  0x21   :  { %32 = dma.hbm_to_vmem [thread:$0]  %s349_s1, 128, %s30_s21, [#allocation6]  }
  0x22   :  { %258 = dma.done.wait [#allocation3], 128  }
  0x23   :  { %259 = vsyncadd [#allocation3], 4294967168 }
  0x24   :  { %260 = dma.done.wait [#allocation6], 128  }
  0x25   :  { %261 = vsyncadd [#allocation6], 4294967168  ;;  %v266_v0 = vmov 0   ;;  %v267_v1 = vmov 2   ;;  %v45_v2 = vld [vmem:[#allocation2] sm:$0xff]  ;;  %v268_v3 = vmov 1   ;;  %v60_v4 = vlaneseq }
  0x26   :  { %183 = vset.pattern.permute.xlu0 %v266_v0  ;;  %185 = vset.pattern.permute.xlu1 %v267_v1  ;;  %v46_v7 = vld [vmem:[#allocation5] sm:$0xff]  ;;  %v172_v15 = vld [vmem:[%s350_s2] ss:$0 sm:$0xff]  ;;  %v269_v24 = vmov 5   ;;  %v270_v25 = vmov 3   ;;  %v271_v26 = vmov 4  }
  0x27   :  { %57 = vperm.xlu0 %183, %v45_v2   ;;  %77 = vperm.xlu1 %185, %v45_v2   ;;  %v61_v5 = vshrl.u32 %v60_v4, 7  ;;  %v47_v27 = vld [vmem:[%s351_s3] sm:$0xff]  ;;  %s272_s3 = smov [#allocation7]  }
  0x28   :  { %v173_v32 = vld [vmem:[%s352_s4] ss:$0 sm:$0xff]  ;;  %s162_s4 = sshll.u32 %s272_s3, 4  ;;  %s163_s4 = int_to_ptr.vmem [resolvable:$true] %s162_s4 }
  0x29   :  { %v62_v6 = vsub.s32 0, %v61_v5  ;;  %v72_v9 = vsub.s32 1, %v61_v5  ;;  %v82_v10 = vsub.s32 2, %v61_v5  ;;  %v131_v33 = vsub.s32 3, %v61_v5  ;;  %s236_s20 = scalar_lea.vmem %s163_s4, 128  ;;  %p241_p3 = scmp.lt.s32.totalorder %s163_s4, %s163_s4 }
  0x2a   :  { %v141_v41 = vsub.s32 4, %v61_v5  ;;  %v151_v43 = vsub.s32 5, %v61_v5  ;;  %p237_p2 = scmp.ne.s32.totalorder %s163_s4, %s236_s20  ;;  %p242_p4 = scmp.lt.s32.totalorder %s236_s20, %s236_s20 }
  0x2b   :  { %184 = vset.pattern.permute.xlu0 %v268_v3  ;;  %186 = vset.pattern.permute.xlu1 %v266_v0  ;;  %v63_v8 = vrot.slane %v46_v7, %v62_v6  ;;  %v73_v13 = vrot.slane %v46_v7, %v72_v9  ;;  %v83_v14 = vrot.slane %v46_v7, %v82_v10 }
  0x2c   :  { %67 = vperm.xlu0 %184, %v45_v2   ;;  %v102_v28 = vrot.slane %v47_v27, %v62_v6  ;;  %v112_v31 = vrot.slane %v47_v27, %v72_v9  ;;  %v122_v35 = vrot.slane %v47_v27, %v82_v10  ;;  %v132_v40 = vrot.slane %v47_v27, %v131_v33  ;;  %p243_p5 = por %p242_p4, %p241_p3 }
  0x2d   :  { %v142_v47 = vrot.slane %v47_v27, %v141_v41  ;;  %v152_v48 = vrot.slane %v47_v27, %v151_v43 }
  0x2e   :  { %p244_p6 = pnand %p243_p5, %p237_p2 }
  0x30   :  { %188 = vset.pattern.permute.xlu0 %v267_v1 }
  0xa6   :  { %v58_v11 = vpop.permute.xlu0 %57  ;;  %v78_v16 = vpop.permute.xlu1 %77 }
  0xa7   :  { %v64_v12 = vmul.f32 %v63_v8, %v58_v11  ;;  %v84_v20 = vmul.f32 %v83_v14, %v78_v16 }
  0xa9   :  { %v65_v18 = vadd.f32 %v172_v15, %v64_v12 }
  0xab   :  { %v68_v17 = vpop.permute.xlu0 %67 }
  0xac   :  { %v74_v19 = vmul.f32 %v73_v13, %v68_v17 }
  0xae   :  { %v75_v21 = vadd.f32 %v74_v19, %v65_v18 }
  0xb0   :  { %v85_v22 = vadd.f32 %v84_v20, %v75_v21 }
  0xb2   :  { %v86_v23 = vmax.f32 %v85_v22, 0.0 }
  0xb4   :  { %116 = vperm.xlu0 %188, %v86_v23   ;;  %96 = vperm.xlu1 %186, %v86_v23  }
  0xb8   :  { %191 = vset.pattern.permute.xlu0 %v269_v24  ;;  %187 = vset.pattern.permute.xlu1 %v268_v3 }
  0xb9   :  { %146 = vperm.xlu0 %191, %v86_v23   ;;  %106 = vperm.xlu1 %187, %v86_v23  }
  0xbd   :  { %189 = vset.pattern.permute.xlu1 %v270_v25 }
  0xbe   :  { %126 = vperm.xlu1 %189, %v86_v23  }
  0xc2   :  { %190 = vset.pattern.permute.xlu1 %v271_v26 }
  0xc3   :  { %136 = vperm.xlu1 %190, %v86_v23  }
 0x133   :  { %v97_v29 = vpop.permute.xlu1 %96  ;;  %v117_v38 = vpop.permute.xlu0 %116 }
 0x134   :  { %v103_v30 = vmul.f32 %v102_v28, %v97_v29  ;;  %v123_v42 = vmul.f32 %v122_v35, %v117_v38 }
 0x136   :  { %v104_v36 = vadd.f32 %v173_v32, %v103_v30 }
 0x138   :  { %v107_v34 = vpop.permute.xlu1 %106  ;;  %v147_v49 = vpop.permute.xlu0 %146 }
 0x139   :  { %v113_v37 = vmul.f32 %v112_v31, %v107_v34  ;;  %v153_v53 = vmul.f32 %v152_v48, %v147_v49 }
 0x13b   :  { %v114_v39 = vadd.f32 %v113_v37, %v104_v36 }
 0x13d   :  { %v127_v44 = vpop.permute.xlu1 %126  ;;  %v124_v45 = vadd.f32 %v123_v42, %v114_v39 }
 0x13e   :  { %v133_v46 = vmul.f32 %v132_v40, %v127_v44 }
 0x140   :  { %v134_v51 = vadd.f32 %v133_v46, %v124_v45 }
 0x142   :  { %v137_v50 = vpop.permute.xlu1 %136 }
 0x143   :  { %v143_v52 = vmul.f32 %v142_v47, %v137_v50 }
 0x145   :  { %v144_v54 = vadd.f32 %v143_v52, %v134_v51 }
 0x147   :  { %v154_v55 = vadd.f32 %v153_v53, %v144_v54 }
 0x149   :  { %155 = vst [vmem:[#allocation7] sm:$0xff] %v154_v55 }
 0x14a   :  { %247 = shalt.err (!%p244_p6)
}
 0x14b   :  { %s248_s23 = scalar_lea.hbm %s353_s5, 128 }
 0x14c   :  { %p249_p7 = scmp.ne.s32.totalorder %s353_s5, %s248_s23  ;;  %p252_p8 = scmp.lt.u32.totalorder %s248_s23, %s353_s5 }
 0x14e   :  { %p254_p9 = pnand %p252_p8, %p249_p7 }
 0x150   :  { %257 = shalt.err (!%p254_p9)
}
 0x151   :  { %165 = dma.vmem_to_hbm [thread:$0]  %s163_s4, 128, %s353_s5, [#allocation4]  }
 0x152   :  { %262 = dma.done.wait [#allocation4], 128  }
 0x153   :  { %263 = vsyncadd [#allocation4], 4294967168 }
 0x154   :  { %169 = vsyncpa [#allocation3], 1 }
 0x155   :  { %170 = vsyncpa [#allocation6], 1 }
 0x156   :  { %171 = vsyncpa [#allocation4], 1 }

</bundles_post_ra>
